<compile_context>
chip_gen: v7x
topology: tpu7x:2x2x1
jax: 0.10.0
libtpu: 0.0.40
codegen_flags: <defaults>
</compile_context>

<pallas_src>
import numpy as np
import jax
import jax.numpy as jnp
from jax import lax
from jax.experimental import pallas as pl
from jax.experimental.pallas import tpu as pltpu


def _round_up(x, m):
    return ((x + m - 1) // m) * m


# --------------------------------------------------------------------------
# Pallas kernel: fused cartesian expansion + FeedForwardNN forward, transposed
# (feature-major) layout.  Per output column r the layer-1 pre-activation is
#     z1[:, r] = TBL[:, ctxt_idx[r]] + TBL[:, S+alt_i[r]] + TBL[:, S+A+alt_j[r]] + b1
# which is computed as a single MXU matmul TBL @ threehot (the three index
# segments are disjoint, so the three-hot matrix performs gather + sum at once).
# TODO(synk): nn.Dropout is treated as identity (eval mode); train-mode RNG
#             dropout is not reproduced.
# --------------------------------------------------------------------------
def fused_mlp_kernel(idx_ref, tbl_ref, b1_ref, w2t_ref, b2_ref, wo_ref, bo_ref,
                     o_ref):
    k = tbl_ref.shape[1]            # K = S + 2A
    tm = idx_ref.shape[1]

    idx = idx_ref[...]                                              # (3, TM) i32
    kio = lax.broadcasted_iota(jnp.int32, (k, tm), 0)
    hot = ((kio == idx[0:1, :]) | (kio == idx[1:2, :]) | (kio == idx[2:3, :]))
    hot_b = jnp.where(hot, 1.0, 0.0).astype(jnp.bfloat16)           # (K, TM)

    # Layer 1: gather + sum of W1 partial products via one MXU matmul, f32 acc.
    z1 = jnp.dot(tbl_ref[...], hot_b, preferred_element_type=jnp.float32)
    h1 = jnp.maximum(z1 + b1_ref[...], 0.0)                         # (H1, TM) f32

    # Layer 2 on the MXU (bf16 operands, f32 accumulation).
    z2 = jnp.dot(w2t_ref[...], h1.astype(w2t_ref.dtype),
                 preferred_element_type=jnp.float32)
    h2 = jnp.maximum(z2 + b2_ref[...], 0.0)                         # (H2, TM) f32

    # Output layer (output_size == 1): keep off the MXU — VPU multiply by the
    # wo column vector + sublane (XLU) reduction.
    y = jnp.sum(wo_ref[...] * h2, axis=0, keepdims=True)            # (1, TM) f32
    o_ref[...] = jnp.maximum(y + bo_ref[0, 0], 0.0) + 0.5


def fused_mlp_forward(idx_all, n_valid, tbl, b1, w2, b2, wo, bo, tm):
    """idx_all: (3, n_pad) int32, tbl: (h1, K) bf16 -> [n_valid, 1] f32."""
    _, n_pad = idx_all.shape
    h1, k = tbl.shape
    h2 = w2.shape[1]
    assert n_pad % tm == 0 and tm % 128 == 0

    w2t = w2.T.astype(jnp.bfloat16)                # (h2, h1)
    b1c = b1.reshape(h1, 1).astype(jnp.float32)    # column vectors broadcast over lanes
    b2c = b2.reshape(h2, 1).astype(jnp.float32)
    woc = wo.reshape(h2, 1).astype(jnp.float32)
    boc = bo.reshape(1, 1).astype(jnp.float32)     # scalar via SMEM

    out = pl.pallas_call(
        fused_mlp_kernel,
        out_shape=jax.ShapeDtypeStruct((1, n_pad), jnp.float32),
        grid_spec=pltpu.PrefetchScalarGridSpec(
            num_scalar_prefetch=0,
            grid=(n_pad // tm,),
            in_specs=[
                pl.BlockSpec((3, tm), lambda i: (0, i)),     # streamed index tile
                pl.BlockSpec((h1, k), lambda i: (0, 0)),     # W1 partial-product table
                pl.BlockSpec((h1, 1), lambda i: (0, 0)),     # b1
                pl.BlockSpec((h2, h1), lambda i: (0, 0)),    # W2^T
                pl.BlockSpec((h2, 1), lambda i: (0, 0)),     # b2
                pl.BlockSpec((h2, 1), lambda i: (0, 0)),     # wo column
                pl.BlockSpec(memory_space=pltpu.MemorySpace.SMEM),  # bo scalar
            ],
            out_specs=pl.BlockSpec((1, tm), lambda i: (0, i)),      # lane-dense output
        ),
        compiler_params=pltpu.CompilerParams(
            dimension_semantics=("parallel",)),
    )(idx_all, tbl, b1c, w2t, b2c, woc, boc)
    return out.reshape(n_pad, 1)[:n_valid]


# --------------------------------------------------------------------------
# Glue (plain JAX): FirstLayers = embedding lookups + concat with continuous
# --------------------------------------------------------------------------
def first_layers(cont_data, cat_data, emb_tables):
    parts = []
    if emb_tables:
        parts += [emb_tables[i][cat_data[:, i]] for i in range(len(emb_tables))]
    if cont_data is not None and cont_data.shape[1] > 0:
        parts.append(cont_data)
    return jnp.concatenate(parts, axis=1) if parts else None


def _cartesian_indices(sessions_sizes, n_pad):
    """Static (numpy) indices reproducing the torch session expansion."""
    ctxt_idx, alt_i, alt_j = [], [], []
    offset = 0
    for s_id, sz in enumerate(sessions_sizes):
        ii, jj = np.meshgrid(np.arange(sz), np.arange(sz), indexing="ij")
        alt_i.append(offset + ii.reshape(-1))     # torch.repeat_interleave(s, sz, 0)
        alt_j.append(offset + jj.reshape(-1))     # s.repeat(sz, 1)
        ctxt_idx.append(np.full(sz * sz, s_id, dtype=np.int64))
        offset += sz
    ctxt_idx = np.concatenate(ctxt_idx).astype(np.int32)
    alt_i = np.concatenate(alt_i).astype(np.int32)
    alt_j = np.concatenate(alt_j).astype(np.int32)
    pad = n_pad - ctxt_idx.shape[0]
    # Pad with index 0 (valid); padded output rows are sliced off afterwards.
    return (np.pad(ctxt_idx, (0, pad)),
            np.pad(alt_i, (0, pad)),
            np.pad(alt_j, (0, pad)))


def trainable_layers_forward(input_data, sessions_sizes, params, tm=2048):
    ctxt_cont, ctxt_cat, alt_cont, alt_cat = input_data
    ctxt = first_layers(ctxt_cont, ctxt_cat, params["ctxt_embs"])
    alt = first_layers(alt_cont, alt_cat, params["alt_embs"])

    num_sessions = len(sessions_sizes)
    total_alts = int(sum(sessions_sizes))
    n = int(sum(sz * sz for sz in sessions_sizes))       # total expanded rows

    ctxt_dim = 0 if ctxt is None else ctxt.shape[1]
    alt_dim = alt.shape[1]

    # Row tile over the expanded dimension: multiple of 128, large (default 2048)
    # to amortize per-grid-step overhead, but capped so the grid keeps >= 2
    # steps when possible (v7x has 2 TensorCores sharded over the parallel axis).
    tm_req = _round_up(max(int(tm), 128), 128)
    if n > 128:
        tm_eff = max(128, min(tm_req, _round_up((n + 1) // 2, 128)))
    else:
        tm_eff = 128
    n_pad = _round_up(n, tm_eff)

    ctxt_idx, alt_i, alt_j = _cartesian_indices(sessions_sizes, n_pad)
    idx_all = jnp.asarray(
        np.stack([ctxt_idx,
                  num_sessions + alt_i,
                  num_sessions + total_alts + alt_j], axis=0).astype(np.int32))

    # Tiny W1 partial products over the un-expanded ctxt/alt features
    # (S and A columns only) — the expanded (F, n_pad) matrix never exists.
    w1 = params["w1"]                                    # (F, h1)
    ctxt_feats = ctxt if ctxt is not None else jnp.zeros((num_sessions, 0),
                                                         jnp.float32)
    p_c = ctxt_feats @ w1[:ctxt_dim]                     # (S, h1)
    p_i = alt @ w1[ctxt_dim:ctxt_dim + alt_dim]          # (A, h1)
    p_j = alt @ w1[ctxt_dim + alt_dim:]                  # (A, h1)
    tbl = jnp.concatenate([p_c, p_i, p_j], axis=0).T.astype(jnp.bfloat16)

    return fused_mlp_forward(idx_all, n, tbl, params["b1"], params["w2"],
                             params["b2"], params["wo"], params["bo"], tm_eff)


# --------------------------------------------------------------------------
# Pure-JAX f32 reference (same semantics as the torch forward, eval mode)
# --------------------------------------------------------------------------
def reference_forward(input_data, sessions_sizes, params):
    ctxt_cont, ctxt_cat, alt_cont, alt_cat = input_data
    ctxt = first_layers(ctxt_cont, ctxt_cat, params["ctxt_embs"])
    alt = first_layers(alt_cont, alt_cat, params["alt_embs"])
    n = int(sum(sz * sz for sz in sessions_sizes))
    ctxt_idx, alt_i, alt_j = _cartesian_indices(sessions_sizes, n)
    parts = []
    if ctxt is not None:
        parts.append(ctxt[ctxt_idx])
    parts += [alt[alt_i], alt[alt_j]]
    x = jnp.concatenate(parts, axis=1)
    h = jnp.maximum(x @ params["w1"] + params["b1"], 0.0)
    h = jnp.maximum(h @ params["w2"] + params["b2"], 0.0)
    y = h @ params["wo"] + params["bo"]
    return jnp.maximum(y, 0.0) + 0.5


# --------------------------------------------------------------------------
# Deterministic parameter init (kaiming-normal-style weights)
# --------------------------------------------------------------------------
def init_params(key, ctxt_emb_dims, alt_emb_dims, input_size, lin_layer_sizes):
    keys = jax.random.split(key, 16)
    k = iter(keys)

    def kaiming(shape_in_out, kk):
        fan_in = shape_in_out[0]
        std = np.sqrt(2.0 / fan_in)
        return (std * jax.random.normal(kk, shape_in_out)).astype(jnp.float32)

    params = {
        "ctxt_embs": [jax.random.normal(next(k), (n, d)).astype(jnp.float32)
                      for (n, d) in ctxt_emb_dims],
        "alt_embs": [jax.random.normal(next(k), (n, d)).astype(jnp.float32)
                     for (n, d) in alt_emb_dims],
    }
    h1, h2 = lin_layer_sizes
    params["w1"] = kaiming((input_size, h1), next(k))
    params["b1"] = (0.01 * jax.random.normal(next(k), (h1,))).astype(jnp.float32)
    params["w2"] = kaiming((h1, h2), next(k))
    params["b2"] = (0.01 * jax.random.normal(next(k), (h2,))).astype(jnp.float32)
    params["wo"] = kaiming((h2, 1), next(k))
    params["bo"] = (0.01 * jax.random.normal(next(k), (1, 1))).astype(jnp.float32)
    return params


if __name__ == "__main__":
    key = jax.random.PRNGKey(0)

    # Module hyper-parameters (small, consistent with the torch module)
    ctxt_emb_dims = [(5, 3), (7, 4)]   # -> 7 embedding dims
    ctxt_no_of_cont = 2                # ctxt feature size = 9
    alt_emb_dims = [(6, 3)]            # -> 3 embedding dims
    alt_no_of_cont = 2                 # alt feature size = 5
    lin_layer_sizes = [32, 16]
    sessions_sizes = [2, 3]            # num sessions = 2, total alternatives = 5
    num_sessions = len(sessions_sizes)
    total_alts = int(np.sum(sessions_sizes))

    ctxt_dim = sum(d for _, d in ctxt_emb_dims) + ctxt_no_of_cont     # 9
    alt_dim = sum(d for _, d in alt_emb_dims) + alt_no_of_cont        # 5
    input_size = ctxt_dim + 2 * alt_dim                               # 19

    params = init_params(key, ctxt_emb_dims, alt_emb_dims,
                         input_size, lin_layer_sizes)

    # Deterministic inputs
    k1, k2, k3, k4 = jax.random.split(jax.random.PRNGKey(0), 4)
    ctxt_cont = jax.random.normal(k1, (num_sessions, ctxt_no_of_cont)).astype(jnp.float32)
    ctxt_cat = jnp.stack(
        [jax.random.randint(k2, (num_sessions,), 0, n) for (n, _) in ctxt_emb_dims],
        axis=1)
    alt_cont = jax.random.normal(k3, (total_alts, alt_no_of_cont)).astype(jnp.float32)
    alt_cat = jnp.stack(
        [jax.random.randint(k4, (total_alts,), 0, n) for (n, _) in alt_emb_dims],
        axis=1)

    input_data = (ctxt_cont, ctxt_cat, alt_cont, alt_cat)
    res = trainable_layers_forward(input_data, sessions_sizes, params)
    res = jax.block_until_ready(res)

    expected_rows = int(np.sum(np.asarray(sessions_sizes) ** 2))
    assert res.shape == (expected_rows, 1), res.shape
    assert bool(jnp.all(res >= 0.5)), "ReLU(x)+0.5 lower bound violated"

    # Compare against the f32 pure-JAX reference (bf16 matmul tolerance).
    ref = jax.block_until_ready(reference_forward(input_data, sessions_sizes, params))
    np.testing.assert_allclose(np.asarray(res), np.asarray(ref), rtol=0.1, atol=0.1)

    print("KERNEL_OK")
</pallas_src>

<mosaic_0001>
module attributes {stable_mosaic.version = 11 : i64} {
  func.func @fused_mlp_kernel(%arg0: i32, %arg1: memref<3x128xi32, #tpu.memory_space<vmem>>, %arg2: memref<32x12xbf16, #tpu.memory_space<vmem>>, %arg3: memref<32x1xf32, #tpu.memory_space<vmem>>, %arg4: memref<16x32xbf16, #tpu.memory_space<vmem>>, %arg5: memref<16x1xf32, #tpu.memory_space<vmem>>, %arg6: memref<16x1xf32, #tpu.memory_space<vmem>>, %arg7: memref<1x1xf32, #tpu.memory_space<smem>>, %arg8: memref<1x128xf32, #tpu.memory_space<vmem>>) attributes {dimension_semantics = [#tpu.dimension_semantics<parallel>], iteration_bounds = array<i64: 1>, scalar_prefetch = 0 : i64, scratch_operands = 0 : i64, tpu.core_type = #tpu.core_type<tc>, window_params = [{transform_indices = @transform_0, window_bounds = array<i64: 3, 128>}, {pipeline_mode = #tpu.pipeline_mode<synchronous>, transform_indices = @transform_1, window_bounds = array<i64: 32, 12>}, {pipeline_mode = #tpu.pipeline_mode<synchronous>, transform_indices = @transform_2, window_bounds = array<i64: 32, 1>}, {pipeline_mode = #tpu.pipeline_mode<synchronous>, transform_indices = @transform_3, window_bounds = array<i64: 16, 32>}, {pipeline_mode = #tpu.pipeline_mode<synchronous>, transform_indices = @transform_4, window_bounds = array<i64: 16, 1>}, {pipeline_mode = #tpu.pipeline_mode<synchronous>, transform_indices = @transform_5, window_bounds = array<i64: 16, 1>}, {transform_indices = @transform_6, window_bounds = array<i64: 1, 1>}, {transform_indices = @transform_7, window_bounds = array<i64: 1, 128>}]} {
    %c0 = arith.constant 0 : index
    %c0_0 = arith.constant 0 : index
    %0 = vector.load %arg1[%c0, %c0_0] : memref<3x128xi32, #tpu.memory_space<vmem>>, vector<3x128xi32>
    %1 = tpu.iota {dimensions = array<i32: 0>} : vector<12x128xi32>
    %2 = vector.extract_strided_slice %0 {offsets = [0, 0], sizes = [1, 128], strides = [1, 1]} : vector<3x128xi32> to vector<1x128xi32>
    %3 = vector.broadcast %2 : vector<1x128xi32> to vector<12x128xi32>
    %4 = arith.cmpi eq, %1, %3 : vector<12x128xi32>
    %5 = vector.extract_strided_slice %0 {offsets = [1, 0], sizes = [1, 128], strides = [1, 1]} : vector<3x128xi32> to vector<1x128xi32>
    %6 = vector.broadcast %5 : vector<1x128xi32> to vector<12x128xi32>
    %7 = arith.cmpi eq, %1, %6 : vector<12x128xi32>
    %8 = arith.ori %4, %7 : vector<12x128xi1>
    %9 = vector.extract_strided_slice %0 {offsets = [2, 0], sizes = [1, 128], strides = [1, 1]} : vector<3x128xi32> to vector<1x128xi32>
    %10 = vector.broadcast %9 : vector<1x128xi32> to vector<12x128xi32>
    %11 = arith.cmpi eq, %1, %10 : vector<12x128xi32>
    %12 = arith.ori %8, %11 : vector<12x128xi1>
    %cst = arith.constant 1.000000e+00 : f32
    %cst_1 = arith.constant 0.000000e+00 : f32
    %13 = vector.broadcast %cst : f32 to vector<12x128xf32>
    %14 = vector.broadcast %cst_1 : f32 to vector<12x128xf32>
    %15 = arith.select %12, %13, %14 : vector<12x128xi1>, vector<12x128xf32>
    %16 = arith.truncf %15 : vector<12x128xf32> to vector<12x128xbf16>
    %c0_2 = arith.constant 0 : index
    %c0_3 = arith.constant 0 : index
    %17 = vector.load %arg2[%c0_2, %c0_3] : memref<32x12xbf16, #tpu.memory_space<vmem>>, vector<32x12xbf16>
    %cst_4 = arith.constant dense<0.000000e+00> : vector<32x128xf32>
    %18 = tpu.matmul %17, %16, %cst_4 {dimension_numbers = #tpu.dot_dimension_numbers<[1], [0], [0], [1], [0, 0, 1, 1], [], []>} : vector<32x12xbf16>, vector<12x128xbf16>, vector<32x128xf32> -> vector<32x128xf32>
    %c0_5 = arith.constant 0 : index
    %c0_6 = arith.constant 0 : index
    %19 = vector.load %arg3[%c0_5, %c0_6] : memref<32x1xf32, #tpu.memory_space<vmem>>, vector<32x1xf32>
    %20 = vector.broadcast %19 : vector<32x1xf32> to vector<32x128xf32>
    %21 = arith.addf %18, %20 : vector<32x128xf32>
    %cst_7 = arith.constant 0.000000e+00 : f32
    %22 = vector.broadcast %cst_7 : f32 to vector<32x128xf32>
    %23 = arith.maximumf %21, %22 : vector<32x128xf32>
    %c0_8 = arith.constant 0 : index
    %c0_9 = arith.constant 0 : index
    %24 = vector.load %arg4[%c0_8, %c0_9] : memref<16x32xbf16, #tpu.memory_space<vmem>>, vector<16x32xbf16>
    %25 = arith.truncf %23 : vector<32x128xf32> to vector<32x128xbf16>
    %cst_10 = arith.constant dense<0.000000e+00> : vector<16x128xf32>
    %26 = tpu.matmul %24, %25, %cst_10 {dimension_numbers = #tpu.dot_dimension_numbers<[1], [0], [0], [1], [0, 0, 1, 1], [], []>} : vector<16x32xbf16>, vector<32x128xbf16>, vector<16x128xf32> -> vector<16x128xf32>
    %c0_11 = arith.constant 0 : index
    %c0_12 = arith.constant 0 : index
    %27 = vector.load %arg5[%c0_11, %c0_12] : memref<16x1xf32, #tpu.memory_space<vmem>>, vector<16x1xf32>
    %28 = vector.broadcast %27 : vector<16x1xf32> to vector<16x128xf32>
    %29 = arith.addf %26, %28 : vector<16x128xf32>
    %cst_13 = arith.constant 0.000000e+00 : f32
    %30 = vector.broadcast %cst_13 : f32 to vector<16x128xf32>
    %31 = arith.maximumf %29, %30 : vector<16x128xf32>
    %c0_14 = arith.constant 0 : index
    %c0_15 = arith.constant 0 : index
    %32 = vector.load %arg6[%c0_14, %c0_15] : memref<16x1xf32, #tpu.memory_space<vmem>>, vector<16x1xf32>
    %33 = vector.broadcast %32 : vector<16x1xf32> to vector<16x128xf32>
    %34 = arith.mulf %33, %31 : vector<16x128xf32>
    %cst_16 = arith.constant dense<0.000000e+00> : vector<128xf32>
    %35 = vector.multi_reduction <add>, %34, %cst_16 [0] : vector<16x128xf32> to vector<128xf32>
    %36 = vector.shape_cast %35 : vector<128xf32> to vector<1x128xf32>
    %c0_17 = arith.constant 0 : index
    %c0_18 = arith.constant 0 : index
    %37 = memref.load %arg7[%c0_17, %c0_18] : memref<1x1xf32, #tpu.memory_space<smem>>
    %38 = vector.broadcast %37 : f32 to vector<1x128xf32>
    %39 = arith.addf %36, %38 : vector<1x128xf32>
    %cst_19 = arith.constant 0.000000e+00 : f32
    %40 = vector.broadcast %cst_19 : f32 to vector<1x128xf32>
    %41 = arith.maximumf %39, %40 : vector<1x128xf32>
    %cst_20 = arith.constant 5.000000e-01 : f32
    %42 = vector.broadcast %cst_20 : f32 to vector<1x128xf32>
    %43 = arith.addf %41, %42 : vector<1x128xf32>
    %c0_21 = arith.constant 0 : index
    %c0_22 = arith.constant 0 : index
    %44 = vector.load %arg8[%c0_21, %c0_22] : memref<1x128xf32, #tpu.memory_space<vmem>>, vector<1x128xf32>
    tpu.vector_store %arg8[%c0_21, %c0_22], %43 {strides = array<i32>} : memref<1x128xf32, #tpu.memory_space<vmem>>, vector<1x128xf32>,
    return
  }
  func.func @transform_0(%arg0: i32) -> (i32, i32) {
    %c0_i32 = arith.constant 0 : i32
    %c0_i32_0 = arith.constant 0 : i32
    return %c0_i32, %arg0 : i32, i32
  }
  func.func @transform_1(%arg0: i32) -> (i32, i32) {
    %c0_i32 = arith.constant 0 : i32
    %c0_i32_0 = arith.constant 0 : i32
    %c0_i32_1 = arith.constant 0 : i32
    return %c0_i32, %c0_i32_0 : i32, i32
  }
  func.func @transform_2(%arg0: i32) -> (i32, i32) {
    %c0_i32 = arith.constant 0 : i32
    %c0_i32_0 = arith.constant 0 : i32
    %c0_i32_1 = arith.constant 0 : i32
    return %c0_i32, %c0_i32_0 : i32, i32
  }
  func.func @transform_3(%arg0: i32) -> (i32, i32) {
    %c0_i32 = arith.constant 0 : i32
    %c0_i32_0 = arith.constant 0 : i32
    %c0_i32_1 = arith.constant 0 : i32
    return %c0_i32, %c0_i32_0 : i32, i32
  }
  func.func @transform_4(%arg0: i32) -> (i32, i32) {
    %c0_i32 = arith.constant 0 : i32
    %c0_i32_0 = arith.constant 0 : i32
    %c0_i32_1 = arith.constant 0 : i32
    return %c0_i32, %c0_i32_0 : i32, i32
  }
  func.func @transform_5(%arg0: i32) -> (i32, i32) {
    %c0_i32 = arith.constant 0 : i32
    %c0_i32_0 = arith.constant 0 : i32
    %c0_i32_1 = arith.constant 0 : i32
    return %c0_i32, %c0_i32_0 : i32, i32
  }
  func.func @transform_6(%arg0: i32) -> (i32, i32) {
    %c0_i32 = arith.constant 0 : i32
    %c0_i32_0 = arith.constant 0 : i32
    %c0_i32_1 = arith.constant 0 : i32
    return %c0_i32, %c0_i32_0 : i32, i32
  }
  func.func @transform_7(%arg0: i32) -> (i32, i32) {
    %c0_i32 = arith.constant 0 : i32
    %c0_i32_0 = arith.constant 0 : i32
    return %c0_i32, %arg0 : i32, i32
  }
}

</mosaic_0001>

<bundles_post_ra>
// kernel: tpu_custom_call.1
= control target key start
LH: loop header
LB: loop body
LE: loop exit
PB: predicated region body
PF: predicated region fallthrough
CT: control target
= control target key end

     0   :  { %v30_v0 = vlaneseq  ;;  %vm96_vm0 = vcmask 97280   ;;  %v329_v2 = vmov 0.0   ;;  %v330_v6 = vmov 0   ;;  %s431_s0 = inlined_call_operand.vmem [shape: s32[3,128], index: 0, kind: input, shape index: {}]   ;;  %s432_s1 = inlined_call_operand.vmem [shape: bf16[32,12], index: 1, kind: input, shape index: {}]   ;;  %s433_s2 = inlined_call_operand.vmem [shape: f32[32,1], index: 2, kind: input, shape index: {}]   ;;  %s434_s3 = inlined_call_operand.vmem [shape: bf16[16,32], index: 3, kind: input, shape index: {}]   ;;  %s435_s4 = inlined_call_operand.vmem [shape: f32[16,1], index: 4, kind: input, shape index: {}]   ;;  %s436_s5 = inlined_call_operand.vmem [shape: f32[16,1], index: 5, kind: input, shape index: {}]   ;;  %s437_s6 = inlined_call_operand.<no memory space> [shape: f32[1,1], index: 6, kind: input, shape index: {}]   ;;  %s438_s7 = inlined_call_operand.hbm [shape: f32[1,128], index: 7, kind: output, shape index: {}]  }
   0x1   :  { %v302_v1 = vld [vmem:[%s432_s1] sm:$0xff]   ;;  %287 = vmatprep.subr.bf16.mxu1 %v329_v2  ;;  %300 = vset.pattern.permute.xlu0 %v330_v6  ;;  %v64_v7 = vld [vmem:[%s433_s2 + $0x10] sm:$0xff]  ;;  %v63_v12 = vld [vmem:[%s433_s2 + $0x8] sm:$0xff] }
   0x2   :  { %v31_v3 = vshrl.u32 %v30_v0, 7  ;;  %v62_v4 = vld [vmem:[%s433_s2] sm:$0xff]  ;;  %283 = vmatprep.mubr.msk.bf16.mxu0 %vm96_vm0, %v302_v1  ;;  %301 = vset.pattern.permute.xlu1 %v330_v6  ;;  %v65_v16 = vld [vmem:[%s433_s2 + $0x18] sm:$0xff] }
   0x3   :  { %v29_v5 = vld [vmem:[%s431_s0] sm:$0x7]  ;;  %68 = vperm.xlu0 %300, %v62_v4   ;;  %78 = vperm.xlu1 %301, %v64_v7  }
   0x4   :  { %v32_v8 = vadd.s32 8, %v31_v3  ;;  %v35_v9 = vsub.s32 0, %v31_v3  ;;  %v41_v10 = vsub.s32 1, %v31_v3  ;;  %v49_v11 = vsub.s32 2, %v31_v3 }
   0x6   :  { %v36_v13 = vrot.slane %v29_v5, %v35_v9  ;;  %v42_v14 = vrot.slane %v29_v5, %v41_v10  ;;  %v50_v15 = vrot.slane %v29_v5, %v49_v11 }
   0x7   :  { %13 = vsyncpa [#allocation4], 0  ;;  %73 = vperm.xlu0 %300, %v63_v12   ;;  %83 = vperm.xlu1 %301, %v65_v16   ;;  %v164_v17 = vld [vmem:[%s435_s4] sm:$0xff]  ;;  %v165_v18 = vld [vmem:[%s435_s4 + $0x8] sm:$0xff]  ;;  %vm103_vm11 = vcmask 1045504   ;;  %vm331_vm12 = vmmov 0   ;;  %v250_v1 = vstv %s437_s6 }
   0x8   :  { %vm37_vm1 = vcmp.eq.s32.totalorder %v31_v3, %v36_v13  ;;  %vm38_vm2 = vcmp.eq.s32.totalorder %v32_v8, %v36_v13  ;;  %vm43_vm3 = vcmp.eq.s32.totalorder %v31_v3, %v42_v14  ;;  %vm44_vm4 = vcmp.eq.s32.totalorder %v32_v8, %v42_v14  ;;  %v228_v21 = vld [vmem:[%s436_s5] sm:$0xff]  ;;  %v229_v23 = vld [vmem:[%s436_s5 + $0x8] sm:$0xff]  ;;  %291 = vmatprep.mubr.msk.bf16.mxu1 %vm331_vm12, %v329_v2  ;;  %s332_s21 = smov [#allocation3]  }
   0x9   :  { %vm45_vm5 = vmor %vm37_vm1, %vm43_vm3  ;;  %vm51_vm6 = vcmp.eq.s32.totalorder %v31_v3, %v50_v15  ;;  %vm52_vm7 = vcmp.eq.s32.totalorder %v32_v8, %v50_v15  ;;  %v303_v25 = vld [vmem:[%s432_s1 + $0x8] sm:$0xff]   ;;  %v304_v44 = vld [vmem:[%s434_s3] sm:$0xff]   ;;  %vm181_vm13 = vcmask 261120   ;;  %s261_s22 = sshll.u32 %s332_s21, 4  ;;  %s262_s22 = int_to_ptr.vmem [resolvable:$true] %s261_s22 }
   0xa   :  { %vm46_vm8 = vmor %vm38_vm2, %vm44_vm4  ;;  %s305_s23 = scalar_lea.vmem %s262_s22, 16  ;;  %s309_s24 = scalar_lea.vmem %s262_s22, 32 }
   0xb   :  { %vm53_vm9 = vmor %vm45_vm5, %vm51_vm6  ;;  %168 = vperm.xlu0 %300, %v164_v17   ;;  %173 = vperm.xlu1 %301, %v165_v18   ;;  %p306_p0 = scmp.ne.s32.totalorder %s262_s22, %s305_s23  ;;  %p310_p1 = scmp.lt.s32.totalorder %s262_s22, %s262_s22 }
   0xc   :  { %vm54_vm10 = vmor %vm46_vm8, %vm52_vm7  ;;  %v55_v19 = vsel %vm53_vm9, 1.0, %v329_v2  ;;  %p311_p2 = scmp.lt.s32.totalorder %s309_s24, %s305_s23 }
   0xd   :  { %v56_v20 = vsel %vm54_vm10, 1.0, %v329_v2 }
   0xe   :  { %v57_v22 = vpack.c.bf16 %v56_v20, %v55_v19  ;;  %p312_p3 = por %p311_p2, %p310_p1 }
   0xf   :  { %232 = vperm.xlu0 %300, %v228_v21   ;;  %237 = vperm.xlu1 %301, %v229_v23  }
  0x10   :  { %295 = vmatprep.subr.msk.bf16.mxu0 %vm103_vm11, %v57_v22  ;;  %v105_v24 = vsel %vm103_vm11, %v57_v22, 0  ;;  %p313_p4 = pnand %p312_p3, %p306_p0 }
  0x11   :  { %282 = vmatpush3.bf16.msra.mxu0 %v105_v24 }
  0x14   :  { %284 = vmatmul.mubr.msk.bf16.vlgmr.msra.gmra.mrb[0].mxu0 %vm96_vm0, %v303_v25 }
  0x82   :  { %v79_v26 = vpop.permute.xlu1 %78  ;;  %v69_v27 = vpop.permute.xlu0 %68 }
  0x86   :  { %v84_v31 = vpop.permute.xlu1 %83  ;;  %v74_v34 = vpop.permute.xlu0 %73 }
  0x8a   :  { %v169_v45 = vpop.permute.xlu0 %168  ;;  %v174_v46 = vpop.permute.xlu1 %173 }
  0x8e   :  { %v233_v55 = vpop.permute.xlu0 %232  ;;  %v238_v56 = vpop.permute.xlu1 %237 }
  0xe7   :  { %v285_v28 = vpop.f32.mrb[0].mxu0 }
  0xe8   :  { %v150_v29 = vadd.f32 %v285_v28, %v79_v26  ;;  %v141_v30 = vpop.f32.mrb[1].mxu0 }
  0xe9   :  { %v142_v32 = vadd.f32 %v141_v30, %v69_v27  ;;  %v286_v33 = vpop.f32.mrb[2].mxu0 }
  0xea   :  { %v153_v35 = vadd.f32 %v286_v33, %v84_v31  ;;  %v144_v36 = vpop.f32.mrb[3].mxu0  ;;  %v158_v38 = vmax.f32 %v150_v29, 0.0 }
  0xeb   :  { %v145_v37 = vadd.f32 %v144_v36, %v74_v34  ;;  %v156_v40 = vmax.f32 %v142_v32, 0.0 }
  0xec   :  { %v159_v39 = vmax.f32 %v153_v35, 0.0 }
  0xed   :  { %v157_v41 = vmax.f32 %v145_v37, 0.0 }
  0xee   :  { %v163_v42 = vpack.c.bf16 %v159_v39, %v158_v38 }
  0xef   :  { %v162_v43 = vpack.c.bf16 %v157_v41, %v156_v40 }
  0xf1   :  { %288 = vmatpush3.bf16.msra.mxu1 %v162_v43 }
  0xf2   :  { %289 = vmatprep.subr.bf16.mxu1 %v329_v2 }
  0xf5   :  { %290 = vmatpush3.bf16.msra.mxu1 %v163_v42 }
  0xf8   :  { %292 = vmatmul.mubr.msk.bf16.vlgmr.msra.gmra.mrb[0].mxu1 %vm181_vm13, %v304_v44 }
 0x1cb   :  { %v219_v47 = vpop.f32.mrb[0].mxu1 }
 0x1cc   :  { %v220_v48 = vadd.f32 %v219_v47, %v169_v45  ;;  %v293_v49 = vpop.f32.mrb[1].mxu1 }
 0x1cd   :  { %v222_v50 = vpop.f32.mrb[2].mxu1 }
 0x1ce   :  { %v226_v51 = vmax.f32 %v220_v48, 0.0  ;;  %v223_v52 = vadd.f32 %v222_v50, %v174_v46  ;;  %v294_v53 = vpop.f32.mrb[3].mxu1 }
 0x1d0   :  { %v227_v54 = vmax.f32 %v223_v52, 0.0  ;;  %v240_v57 = vmul.f32 %v233_v55, %v226_v51 }
 0x1d2   :  { %v241_v58 = vmul.f32 %v238_v56, %v227_v54 }
 0x1d4   :  { %v242_v59 = vadd.f32 %v241_v58, %v240_v57 }
 0x1d6   :  { %v243_v60 = vrot.slane %v242_v59, 4 }
 0x1d8   :  { %v244_v61 = vadd.f32 %v243_v60, %v242_v59 }
 0x1da   :  { %v245_v62 = vrot.slane %v244_v61, 2 }
 0x1dc   :  { %v246_v63 = vadd.f32 %v245_v62, %v244_v61 }
 0x1de   :  { %v247_v0 = vrot.slane %v246_v63, 1 }
 0x1e0   :  { %v248_v2 = vadd.f32 %v247_v0, %v246_v63 }
 0x1e2   :  { %v251_v3 = vadd.f32 %v250_v1, %v248_v2 }
 0x1e4   :  { %v252_v4 = vmax.f32 %v251_v3, 0.0 }
 0x1e6   :  { %v253_v5 = vadd.f32 0.5, %v252_v4 }
 0x1e8   :  { %254 = vst [vmem:[#allocation3] sm:$0x1] %v253_v5 }
 0x1e9   :  { %316 = shalt.err (!%p313_p4)
}
 0x1ea   :  { %s317_s6 = scalar_lea.hbm %s438_s7, 16 }
 0x1eb   :  { %p318_p5 = scmp.ne.s32.totalorder %s438_s7, %s317_s6  ;;  %p321_p6 = scmp.lt.u32.totalorder %s317_s6, %s438_s7 }
 0x1ed   :  { %p323_p7 = pnand %p321_p6, %p318_p5 }
 0x1ef   :  { %326 = shalt.err (!%p323_p7)
}
 0x1f0   :  { %264 = dma.vmem_to_hbm [thread:$0]  %s262_s22, 16, %s438_s7, [#allocation4]  }
 0x1f1   :  { %327 = dma.done.wait [#allocation4], 16  }
 0x1f2   :  { %328 = vsyncadd [#allocation4], 4294967280 }
 0x1f3   :  { %268 = vsyncpa [#allocation4], 1 }

</bundles_post_ra>
